<compile_context>
chip_gen: v5e
topology: v5e:2x2
jax: 0.10.0
libtpu: 0.0.40
codegen_flags: <defaults>
</compile_context>

<pallas_src>
import functools
import math

import jax
import jax.numpy as jnp
from jax.experimental import pallas as pl
from jax.experimental.pallas import tpu as pltpu


def gated_mlp_kernel(x_ref, wg_ref, wu_ref, wp_ref, o_ref, acc_ref):
    # x_ref  : (tm, E)   row tile (resident across the inner I loop)
    # wg_ref : (E, ti)   gate-weight tile (column tile of the fused W_fc)
    # wu_ref : (E, ti)   up-weight tile   (column tile of the fused W_fc)
    # wp_ref : (ti, E)   down-projection tile
    # o_ref  : (tm, E)   output tile (written on the last I step)
    # acc_ref: (tm, E)   f32 VMEM accumulator (persists across the I axis)
    j = pl.program_id(1)

    @pl.when(j == 0)
    def _():
        acc_ref[...] = jnp.zeros_like(acc_ref)

    x = x_ref[...]
    # Two lane-dense MXU matmuls with f32 accumulation.
    a = jnp.dot(x, wg_ref[...], preferred_element_type=jnp.float32)
    g = jnp.dot(x, wu_ref[...], preferred_element_type=jnp.float32)

    # SiLU(a) * g in f32 (sigmoid -> EUP, mul/gate -> VPU).
    h = (a * jax.nn.sigmoid(a)) * g

    # Accumulate the down projection for this I-tile.
    acc_ref[...] += jnp.dot(h.astype(wp_ref.dtype), wp_ref[...],
                            preferred_element_type=jnp.float32)

    @pl.when(j == pl.num_programs(1) - 1)
    def _():
        o_ref[...] = acc_ref[...].astype(o_ref.dtype)


def _round_up(x, a):
    return ((x + a - 1) // a) * a


def _divisor_tile(dim, target, align):
    """Largest multiple of `align` that divides `dim` and is <= target.
    Returns `dim` itself when dim <= target (full-extent blocks are always
    layout-legal).  Returns None if no aligned divisor exists."""
    if dim <= target:
        return dim
    t = (min(target, dim) // align) * align
    while t >= align:
        if dim % t == 0:
            return t
        t -= align
    return None


def _pick_tiles(m, e, inter, x_itemsize, w_itemsize, o_itemsize,
                block_m, block_i, vmem_usable):
    """Dtype- and VMEM-aware (tm, ti) selection."""
    align_m = 16 if x_itemsize == 2 else 8      # bf16 packs 2 rows / sublane

    # ---- intermediate (reduction) tile: multiple of 128 dividing I ----------
    ti_target = block_i if block_i is not None else 512
    ti = _divisor_tile(inter, ti_target, 128)
    fused = ti is not None
    if not fused:
        ti = inter                               # un-tiled fallback

    # VMEM model (double-buffered by the BlockSpec pipeline):
    #   weights: 3 tiles (gate/up/proj) * E*ti * itemsize * 2 buffers
    #   rows   : x tile + out tile (2 buffers each) + f32 accumulator scratch
    def w_bytes(t):
        return 3 * e * t * w_itemsize * 2
    per_row = e * (2 * x_itemsize + 2 * o_itemsize + 4)

    # Shrink ti (keeping 128-aligned divisibility) if the weight tiles alone
    # would not leave room for even one aligned row tile.
    while (fused and block_i is None and ti > 128
           and vmem_usable - w_bytes(ti) < per_row * align_m):
        smaller = _divisor_tile(inter, ti // 2, 128)
        if smaller is None or smaller >= ti:
            break
        ti = smaller

    # ---- row tile ------------------------------------------------------------
    m_aligned = _round_up(m, align_m)
    if block_m is not None:
        tm_target = block_m
    else:
        # Roofline-ish targets so per-step MXU work hides the weight-tile DMA:
        # ~240 rows suffice on v5e, ~680 on v6e, ~330/TC on v7x.  64-MiB VMEM
        # (v7x) -> aim 512; 128-MiB chips (v5e/v6e) -> aim 1024.
        tm_target = 512 if vmem_usable <= (48 << 20) else 1024

    budget_rows = (vmem_usable - w_bytes(ti)) // per_row
    tm = min(tm_target, max(budget_rows, align_m), m_aligned)
    tm = max(align_m, (tm // align_m) * align_m)
    return tm, ti, fused, align_m


@functools.partial(jax.jit, static_argnames=("block_m", "block_i"))
def gated_mlp(x, w_fc, w_proj, *, block_m=None, block_i=None):
    """x: [B, S, E]; w_fc: [E, 2*I] (gate cols then up cols); w_proj: [I, E].

    bf16 x / weights is the fast path (MXU bf16 rate, half the weight stream);
    accumulation is f32 regardless of input dtype.
    """
    b, s, e = x.shape
    inter = w_proj.shape[0]
    assert w_fc.shape == (e, 2 * inter)
    m = b * s
    x2d = x.reshape(m, e)

    x_it = jnp.dtype(x.dtype).itemsize
    w_it = jnp.dtype(w_fc.dtype).itemsize
    wp_it = jnp.dtype(w_proj.dtype).itemsize
    o_it = x_it

    # Scoped-VMEM budget (defaults are far below physical); leave headroom.
    try:
        vmem_cap = int(pltpu.get_tpu_info().vmem_capacity_bytes)
    except Exception:
        vmem_cap = 128 << 20
    vmem_limit = (vmem_cap * 3) // 4          # requested scoped-VMEM limit
    vmem_usable = int(vmem_limit * 0.85)      # headroom for compiler internals

    tm, ti, fused, align_m = _pick_tiles(
        m, e, inter, x_it, max(w_it, wp_it), o_it, block_m, block_i, vmem_usable)

    # Pad rows so every row block is full size (keeps tuned tiles and the
    # megacore "parallel" split intact; padded rows are zeros and sliced off).
    m_pad = _round_up(m, tm)
    if m_pad != m:
        x2d = jnp.pad(x2d, ((0, m_pad - m), (0, 0)))
    n_row = m_pad // tm
    n_i = (inter // ti) if fused else 1
    grid = (n_row, n_i)

    if fused:
        # Zero-copy gate/up: pass the fused (E, 2I) weight twice and address the
        # "up" half by offsetting the block index by inter // ti.
        wg_arr, wu_arr = w_fc, w_fc
        wg_spec = pl.BlockSpec((e, ti), lambda i, j: (0, j))
        wu_spec = pl.BlockSpec((e, ti), lambda i, j, _n=n_i: (0, j + _n))
        wp_spec = pl.BlockSpec((ti, e), lambda i, j: (j, 0))
    else:
        # TODO(synk): intermediate sizes with no 128-aligned divisor fall back
        # to a one-time split + un-tiled (full-I) weight residency.
        wg_arr = jax.lax.slice(w_fc, (0, 0), (e, inter))
        wu_arr = jax.lax.slice(w_fc, (0, inter), (e, 2 * inter))
        wg_spec = pl.BlockSpec((e, inter), lambda i, j: (0, 0))
        wu_spec = pl.BlockSpec((e, inter), lambda i, j: (0, 0))
        wp_spec = pl.BlockSpec((inter, e), lambda i, j: (0, 0))

    # Advisory cost: includes the (M/tm)x weight re-streaming across row tiles.
    flops = 2 * m_pad * e * (2 * inter) + 2 * m_pad * inter * e
    bytes_accessed = (m_pad * e * x_it + m_pad * e * o_it
                      + n_row * (e * 2 * inter * w_it + inter * e * wp_it))

    out2d = pl.pallas_call(
        gated_mlp_kernel,
        out_shape=jax.ShapeDtypeStruct((m_pad, e), x.dtype),
        grid_spec=pltpu.PrefetchScalarGridSpec(
            num_scalar_prefetch=0,
            grid=grid,
            in_specs=[
                pl.BlockSpec((tm, e), lambda i, j: (i, 0)),   # x rows
                wg_spec,                                      # W_gate I-tile
                wu_spec,                                      # W_up   I-tile
                wp_spec,                                      # W_proj I-tile
            ],
            out_specs=pl.BlockSpec((tm, e), lambda i, j: (i, 0)),
            scratch_shapes=[pltpu.VMEM((tm, e), jnp.float32)],
        ),
        compiler_params=pltpu.CompilerParams(
            dimension_semantics=("parallel", "arbitrary"),
            vmem_limit_bytes=vmem_limit),
        cost_estimate=pl.CostEstimate(
            flops=flops,
            transcendentals=m_pad * inter,        # sigmoid
            bytes_accessed=bytes_accessed),
    )(x2d, wg_arr, wu_arr, w_proj)

    if m_pad != m:
        out2d = out2d[:m]
    return out2d.reshape(b, s, e)


def gated_mlp_ref(x, w_fc, w_proj):
    inter = w_proj.shape[0]
    fc = jnp.dot(x, w_fc)
    a, g = fc[..., :inter], fc[..., inter:]
    return jnp.dot(jax.nn.silu(a) * g, w_proj)


if __name__ == "__main__":
    # Small config: batch=2, seq=64, n_embd=128, intermediate_size=256.
    batch, seq, n_embd, intermediate = 2, 64, 128, 256

    key = jax.random.PRNGKey(0)
    kx, kfc, kproj = jax.random.split(key, 3)

    x = jax.random.normal(kx, (batch, seq, n_embd), dtype=jnp.float32)
    bound_fc = 1.0 / math.sqrt(n_embd)
    bound_pr = 1.0 / math.sqrt(intermediate)
    w_fc = jax.random.uniform(kfc, (n_embd, 2 * intermediate),
                              minval=-bound_fc, maxval=bound_fc,
                              dtype=jnp.float32)
    w_proj = jax.random.uniform(kproj, (intermediate, n_embd),
                                minval=-bound_pr, maxval=bound_pr,
                                dtype=jnp.float32)

    ref = gated_mlp_ref(x, w_fc, w_proj)

    # 1) multi-tile grid with I-accumulation and fused-weight block offsets
    #    (grid = (4, 2)), f32 test path.
    out_tiled = jax.block_until_ready(
        gated_mlp(x, w_fc, w_proj, block_m=32, block_i=128))
    # 2) non-divisible row tile -> exercises the M-padding path (grid = (3, 2)).
    out_pad = jax.block_until_ready(
        gated_mlp(x, w_fc, w_proj, block_m=48, block_i=128))
    # 3) auto (dtype/VMEM-aware) tile defaults -> clamps to the small dims.
    out_auto = jax.block_until_ready(gated_mlp(x, w_fc, w_proj))
    # 4) bf16 fast path (MXU dtype), looser tolerance.
    out_bf16 = jax.block_until_ready(
        gated_mlp(x.astype(jnp.bfloat16), w_fc.astype(jnp.bfloat16),
                  w_proj.astype(jnp.bfloat16), block_m=32, block_i=128))

    assert out_tiled.shape == (batch, seq, n_embd)
    assert jnp.allclose(out_tiled, ref, atol=1e-4, rtol=1e-4), "tiled mismatch"
    assert jnp.allclose(out_pad, ref, atol=1e-4, rtol=1e-4), "padded mismatch"
    assert jnp.allclose(out_auto, ref, atol=1e-4, rtol=1e-4), "auto-tile mismatch"
    assert jnp.allclose(out_bf16.astype(jnp.float32), ref,
                        atol=5e-2, rtol=5e-2), "bf16 mismatch"

    print("KERNEL_OK")
</pallas_src>

<mosaic_0001>
module attributes {stable_mosaic.version = 11 : i64} {
  func.func @gated_mlp_kernel(%arg0: i32, %arg1: i32, %arg2: memref<32x128xf32, #tpu.memory_space<vmem>>, %arg3: memref<128x128xf32, #tpu.memory_space<vmem>>, %arg4: memref<128x128xf32, #tpu.memory_space<vmem>>, %arg5: memref<128x128xf32, #tpu.memory_space<vmem>>, %arg6: memref<32x128xf32, #tpu.memory_space<vmem>>, %arg7: memref<32x128xf32, #tpu.memory_space<vmem>>) attributes {dimension_semantics = [#tpu.dimension_semantics<parallel>, #tpu.dimension_semantics<arbitrary>], iteration_bounds = array<i64: 4, 2>, scalar_prefetch = 0 : i64, scratch_operands = 1 : i64, tpu.core_type = #tpu.core_type<tc>, window_params = [{transform_indices = @transform_0, window_bounds = array<i64: 32, 128>}, {transform_indices = @transform_1, window_bounds = array<i64: 128, 128>}, {transform_indices = @transform_2, window_bounds = array<i64: 128, 128>}, {transform_indices = @transform_3, window_bounds = array<i64: 128, 128>}, {transform_indices = @transform_4, window_bounds = array<i64: 32, 128>}]} {
    %c0_i32 = arith.constant 0 : i32
    %0 = arith.cmpi eq, %arg1, %c0_i32 : i32
    %1 = arith.extui %0 : i1 to i32
    %c0_i32_0 = arith.constant 0 : i32
    %2 = arith.cmpi ne, %1, %c0_i32_0 : i32
    scf.if %2 {
      %cst_16 = arith.constant 0.000000e+00 : f32
      %23 = vector.broadcast %cst_16 : f32 to vector<32x128xf32>
      %c0_17 = arith.constant 0 : index
      %c0_18 = arith.constant 0 : index
      %24 = vector.load %arg7[%c0_17, %c0_18] : memref<32x128xf32, #tpu.memory_space<vmem>>, vector<32x128xf32>
      tpu.vector_store %arg7[%c0_17, %c0_18], %23 {strides = array<i32>} : memref<32x128xf32, #tpu.memory_space<vmem>>, vector<32x128xf32>,
    } else {
    }
    %c0 = arith.constant 0 : index
    %c0_1 = arith.constant 0 : index
    %3 = vector.load %arg2[%c0, %c0_1] : memref<32x128xf32, #tpu.memory_space<vmem>>, vector<32x128xf32>
    %c0_2 = arith.constant 0 : index
    %c0_3 = arith.constant 0 : index
    %4 = vector.load %arg3[%c0_2, %c0_3] : memref<128x128xf32, #tpu.memory_space<vmem>>, vector<128x128xf32>
    %cst = arith.constant dense<0.000000e+00> : vector<32x128xf32>
    %5 = tpu.matmul %3, %4, %cst {dimension_numbers = #tpu.dot_dimension_numbers<[1], [0], [0], [1], [0, 0, 1, 1], [], []>} : vector<32x128xf32>, vector<128x128xf32>, vector<32x128xf32> -> vector<32x128xf32>
    %c0_4 = arith.constant 0 : index
    %c0_5 = arith.constant 0 : index
    %6 = vector.load %arg4[%c0_4, %c0_5] : memref<128x128xf32, #tpu.memory_space<vmem>>, vector<128x128xf32>
    %cst_6 = arith.constant dense<0.000000e+00> : vector<32x128xf32>
    %7 = tpu.matmul %3, %6, %cst_6 {dimension_numbers = #tpu.dot_dimension_numbers<[1], [0], [0], [1], [0, 0, 1, 1], [], []>} : vector<32x128xf32>, vector<128x128xf32>, vector<32x128xf32> -> vector<32x128xf32>
    %8 = arith.negf %5 : vector<32x128xf32>
    %9 = math.exp %8 : vector<32x128xf32>
    %cst_7 = arith.constant 1.000000e+00 : f32
    %10 = vector.broadcast %cst_7 : f32 to vector<32x128xf32>
    %11 = arith.addf %10, %9 : vector<32x128xf32>
    %12 = arith.divf %10, %11 : vector<32x128xf32>
    %13 = arith.mulf %5, %12 : vector<32x128xf32>
    %14 = arith.mulf %13, %7 : vector<32x128xf32>
    %c0_8 = arith.constant 0 : index
    %c0_9 = arith.constant 0 : index
    %15 = vector.load %arg7[%c0_8, %c0_9] : memref<32x128xf32, #tpu.memory_space<vmem>>, vector<32x128xf32>
    %c0_10 = arith.constant 0 : index
    %c0_11 = arith.constant 0 : index
    %16 = vector.load %arg5[%c0_10, %c0_11] : memref<128x128xf32, #tpu.memory_space<vmem>>, vector<128x128xf32>
    %cst_12 = arith.constant dense<0.000000e+00> : vector<32x128xf32>
    %17 = tpu.matmul %14, %16, %cst_12 {dimension_numbers = #tpu.dot_dimension_numbers<[1], [0], [0], [1], [0, 0, 1, 1], [], []>} : vector<32x128xf32>, vector<128x128xf32>, vector<32x128xf32> -> vector<32x128xf32>
    %18 = arith.addf %15, %17 : vector<32x128xf32>
    %c0_13 = arith.constant 0 : index
    %c0_14 = arith.constant 0 : index
    %19 = vector.load %arg7[%c0_13, %c0_14] : memref<32x128xf32, #tpu.memory_space<vmem>>, vector<32x128xf32>
    tpu.vector_store %arg7[%c0_13, %c0_14], %18 {strides = array<i32>} : memref<32x128xf32, #tpu.memory_space<vmem>>, vector<32x128xf32>,
    %c1_i32 = arith.constant 1 : i32
    %20 = arith.cmpi eq, %arg1, %c1_i32 : i32
    %21 = arith.extui %20 : i1 to i32
    %c0_i32_15 = arith.constant 0 : i32
    %22 = arith.cmpi ne, %21, %c0_i32_15 : i32
    scf.if %22 {
      %c0_16 = arith.constant 0 : index
      %c0_17 = arith.constant 0 : index
      %23 = vector.load %arg7[%c0_16, %c0_17] : memref<32x128xf32, #tpu.memory_space<vmem>>, vector<32x128xf32>
      %c0_18 = arith.constant 0 : index
      %c0_19 = arith.constant 0 : index
      %24 = vector.load %arg6[%c0_18, %c0_19] : memref<32x128xf32, #tpu.memory_space<vmem>>, vector<32x128xf32>
      tpu.vector_store %arg6[%c0_18, %c0_19], %23 {strides = array<i32>} : memref<32x128xf32, #tpu.memory_space<vmem>>, vector<32x128xf32>,
    } else {
    }
    return
  }
  func.func @transform_0(%arg0: i32, %arg1: i32) -> (i32, i32) {
    %c0_i32 = arith.constant 0 : i32
    %c0_i32_0 = arith.constant 0 : i32
    return %arg0, %c0_i32 : i32, i32
  }
  func.func @transform_1(%arg0: i32, %arg1: i32) -> (i32, i32) {
    %c0_i32 = arith.constant 0 : i32
    %c0_i32_0 = arith.constant 0 : i32
    return %c0_i32, %arg1 : i32, i32
  }
  func.func @transform_2(%arg0: i32, %arg1: i32) -> (i32, i32) {
    %c2_i32 = arith.constant 2 : i32
    %0 = arith.addi %arg1, %c2_i32 : i32
    %c0_i32 = arith.constant 0 : i32
    %c0_i32_0 = arith.constant 0 : i32
    return %c0_i32, %0 : i32, i32
  }
  func.func @transform_3(%arg0: i32, %arg1: i32) -> (i32, i32) {
    %c0_i32 = arith.constant 0 : i32
    %c0_i32_0 = arith.constant 0 : i32
    return %arg1, %c0_i32 : i32, i32
  }
  func.func @transform_4(%arg0: i32, %arg1: i32) -> (i32, i32) {
    %c0_i32 = arith.constant 0 : i32
    %c0_i32_0 = arith.constant 0 : i32
    return %arg0, %c0_i32 : i32, i32
  }
}

</mosaic_0001>

<bundles_post_ra>
// kernel: gated_mlp.1
= control target key start
LH: loop header
LB: loop body
LE: loop exit
PB: predicated region body
PF: predicated region fallthrough
CT: control target
= control target key end

     0   :  { %s1715_s0 = inlined_call_operand.hbm [shape: f32[128,128], index: 0, kind: input, shape index: {}]   ;;  %s1716_s1 = inlined_call_operand.hbm [shape: f32[128,512], index: 1, kind: input, shape index: {}, may-alias: {1,2}]   ;;  %s1717_s2 = inlined_call_operand.hbm [shape: f32[128,512], index: 2, kind: input, shape index: {}, may-alias: {1,2}]   ;;  %s1718_s3 = inlined_call_operand.hbm [shape: f32[256,128], index: 3, kind: input, shape index: {}]   ;;  %s1719_s4 = inlined_call_operand.hbm [shape: f32[128,128], index: 4, kind: output, shape index: {}]  }
   0x1   :  { %1741 = sst [smem:[#allocation32_spill]] %s1715_s0 }
   0x2   :  { %1742 = sst [smem:[#allocation33_spill]] %s1716_s1 }
   0x3   :  { %1743 = sst [smem:[#allocation34_spill]] %s1717_s2 }
   0x4   :  { %1744 = sst [smem:[#allocation35_spill]] %s1718_s3 }
   0x5   :  { %1745 = sst [smem:[#allocation36_spill]] %s1719_s4 }
   0x6   :  { %9 = vsyncpa [#allocation4], 0 }
   0x7   :  { %11 = vsyncpa [#allocation4 + $0x1], 0 }
   0x8   :  { %12 = vsyncpa [#allocation7], 0 }
   0x9   :  { %14 = vsyncpa [#allocation7 + $0x1], 0 }
   0xa   :  { %15 = vsyncpa [#allocation10], 0 }
   0xb   :  { %17 = vsyncpa [#allocation10 + $0x1], 0 }
   0xc   :  { %18 = vsyncpa [#allocation5], 0 }
   0xd   :  { %20 = vsyncpa [#allocation5 + $0x1], 0  ;;  %s1304_s15 = smov 0   ;;  %s1306_s16 = smov 0  }
   0xe   :  { %s1308_s17 = smov 0   ;;  %s1310_s18 = smov 0  }
   0xf   :  { %s1312_s19 = smov 0   ;;  %s1314_s20 = smov 0  }
  0x10   :  { %s1316_s21 = smov 0   ;;  %s1318_s22 = smov 0  }
  0x11   :  { %s1320_s23 = smov 0   ;;  %s1322_s24 = smov 0  }
  0x12   :  { %s1324_s25 = smov 0   ;;  %s1326_s26 = smov 0  }
  0x13   :  { %s1328_s27 = smov 0   ;;  %s1330_s28 = smov 0  }
  0x14 LB: > { %1746 = sst [smem:[#allocation17_spill]] %s1227_s17  ;;  %p1730_p0 = scmp.eq.s32.totalorder %s1271_s28, 0  ;;  %s1271_s28 = sphi %s1330_s28, %s26_s28   ;;  %s1267_s27 = sphi %s1328_s27, %s1801_s27   ;;  %s1263_s26 = sphi %s1326_s26, %s1811_s26   ;;  %s1259_s25 = sphi %s1324_s25, %s1799_s25   ;;  %s1255_s24 = sphi %s1322_s24, %s1810_s24   ;;  %s1251_s23 = sphi %s1320_s23, %s1798_s23   ;;  %s1247_s22 = sphi %s1318_s22, %s1809_s22   ;;  %s1243_s21 = sphi %s1316_s21, %s1808_s21   ;;  %s1239_s20 = sphi %s1314_s20, %s1807_s20   ;;  %s1235_s19 = sphi %s1312_s19, %s1806_s19   ;;  %s1231_s18 = sphi %s1310_s18, %s1805_s18   ;;  %s1227_s17 = sphi %s1308_s17, %s1795_s17   ;;  %s1223_s16 = sphi %s1306_s16, %s1804_s16   ;;  %s1219_s15 = sphi %s1304_s15, %s1803_s15  }
  0x15   : > { %1747 = sst [smem:[#allocation18_spill]] %s1243_s21  ;;  %p78_p1 = scmp.ne.s32.totalorder %s1239_s20, %s1235_s19 }
  0x16   : > { %1748 = sst [smem:[#allocation19_spill]] %s1251_s23  ;;  %p84_p2 = scmp.ne.s32.totalorder %s1235_s19, %s1231_s18 }
  0x17   : > { %1749 = sst [smem:[#allocation20_spill]] %s1255_s24  ;;  %p80_p3 = por %p78_p1, %p1730_p0 }
  0x18   : > { %1750 = sst [smem:[#allocation21_spill]] %s1259_s25  ;;  %p1731_p4 = scmp.lt.s32.totalorder %s1271_s28, 8 }
  0x19   : > { %1751 = sst [smem:[#allocation22_spill]] %s1267_s27  ;;  %s210_s5 = sand.u32 1, %s1271_s28  }
  0x1a   : > { %1752 = sst [smem:[#allocation23_spill]] %s1271_s28  ;;  %s1720_s6 = sand.u32 1, %s1239_s20  }
  0x1b   : > { %s1388_s7 = sshll.u32 %s1720_s6, 7  ;;  %s788_s8 = sshll.u32 %s1263_s26, 3 }
  0x1c   : > { %s1753_s1 = sld [smem:[#allocation33_spill]]  ;;  %s214_s12 = scalar_lea.vmem [#allocation6], %s1388_s7 }
  0x1d   : > { %s221_s13 = sshll.u32 %s214_s12, 4  ;;  %p1397_p5 = pnand %p1731_p4, %p80_p3  ;;  %s222_s13 = int_to_ptr.vmem [resolvable:$true] %s221_s13 }
  0x1e   : > { %s1755_s2 = sld [smem:[#allocation34_spill]]  ;;  %s1404_s12 = scalar_lea.sflag [#allocation7], %s210_s5 }
  0x1f   : > { %s1725_s4 = smov 8   ;;  %p794_p6 = scmp.ge.s32.totalorder %s1271_s28, 1 }
  0x20   : > { %p273_p7 = scmp.lt.s32.totalorder %s1271_s28, 9  ;;  %s1422_s5 = sadd.s32 4294967295, %s1271_s28  }
  0x21   : > { %p52_p10 = scmp.ne.s32.totalorder %s1251_s23, %s1247_s22  ;;  %p58_p12 = scmp.ne.s32.totalorder %s1247_s22, %s1243_s21 }
  0x22   : > { %s218_s11 = scalar_lea.hbm %s1753_s1, %s788_s8  ;;  %s1723_s1 = smov 128  }
  0x23   : > { %s219_s14 = sshll.u32 %s218_s11, 4  ;;  %s1722_s11 = smov 512   ;;  %s220_s14 = int_to_ptr.hbm [resolvable:$true] %s219_s14 }
  0x24   : > { %s676_s9 = scalar_lea.hbm %s1755_s2, %s788_s8  ;;  %p1417_p8 = pnand %p794_p6, %p273_p7 }
  0x25   : > { %s677_s10 = scalar_lea.hbm %s676_s9, 16  ;;  %s781_s8 = sadd.s32 4294967294, %s1271_s28  }
  0x26   : > { %846 = dma.hbm_to_vmem [thread:$0]  (!%p1397_p5), %s220_s14, 2048, %s222_s13, %s1404_s12, %s1722_s11, %s1723_s1, %s1725_s4  }
  0x27   : > { %s1412_s29 = sshll.u32 %s677_s10, 4  ;;  %s35_s13 = sadd.s32 1, %s1263_s26 }
  0x28   : > { %1756 = sst [smem:[#allocation24_spill]] %s1412_s29  ;;  %p36_p9 = scmp.ge.s32.totalorder %s35_s13, 2 }
  0x29   : > { %s1757_s30 = scalar_select %p1417_p8, 1, 0 }
  0x2a   : > { %s38_s14 = sadd.s32 1, %s1267_s27  ;;  %s45_s9 = sadd.s32 1, %s1251_s23 }
  0x2b   : > { %1758 = sst [smem:[#allocation25_spill]] %s1757_s30  ;;  %s1813_s13 = smov (%p36_p9, %s35_s13), 0 }
  0x2c   : > { %1759 = sst [smem:[#allocation26_spill]] %s1813_s13  ;;  %s1815_s14 = smov (!%p36_p9, %s38_s14), %s1267_s27 }
  0x2d   : > { %p1438_p11 = por %p1730_p0, %p52_p10  ;;  %p40_p13 = scmp.ge.s32.totalorder %s1815_s14, 4 }
  0x2e   : > { %p1737_p1 = scmp.eq.s32.totalorder %s1422_s5, 0  ;;  %s68_s11 = ssub.s32 %s1263_s26, %s1813_s13 }
  0x2f   : > { %s95_s1 = sadd.s32 2, %s1813_s13  ;;  %s1817_s14 = smov (%p40_p13, %s1815_s14), 0 }
  0x30   : > { %1761 = sst [smem:[#allocation27_spill]] %s1817_s14  ;;  %p1455_p3 = por %p1737_p1, %p58_p12 }
  0x31   : > { %p69_p6 = scmp.eq.s32.totalorder %s68_s11, 0  ;;  %s42_s29 = ssub.s32 %s1267_s27, %s1817_s14 }
  0x32   : > { %p1466_p7 = por %p84_p2, %p1737_p1  ;;  %p43_p9 = scmp.eq.s32.totalorder %s42_s29, 0 }
  0x33   : > { %s1764_s13 = sadd.s32 2, %s1263_s26  ;;  %s1765_s24 = sadd.s32 1, %s1239_s20 }
  0x34   : > { %s96_s25 = ssub.s32 %s1764_s13, %s95_s1  ;;  %p162_p0 = scmp.eq.s32.totalorder %s1422_s5, 7 }
  0x35   : > { %s1475_s30 = scalar_select %p69_p6, %s1239_s20, %s1765_s24  }
  0x36   : > { %s1478_s3 = scalar_select %p43_p9, %s1251_s23, %s45_s9  }
  0x37   : > { %1766 = sst [smem:[#allocation28_spill]] %s1475_s30  ;;  %p97_p13 = scmp.eq.s32.totalorder %s96_s25, 0 }
  0x38   : > { %1767 = sst [smem:[#allocation29_spill]] %s1478_s3  ;;  %p168_p4 = scmp.eq.s32.totalorder %s781_s8, 7 }
  0x39   : > { %s188_s18 = sand.u32 1, %s1251_s23   ;;  %p1485_p2 = por %p162_p0, %p52_p10 }
  0x3a   : > { %p1492_p6 = por %p168_p4, %p58_p12  ;;  %s784_s24 = sshll.u32 %s188_s18, 5 }
  0x3b   : > { %s811_s29 = sshll.u32 %s1267_s27, 5  ;;  %s1771_s0 = sld [smem:[#allocation32_spill]] }
  0x3c   : > { %s1769_s1 = scalar_select %p1492_p6, 1, 0 }
  0x3d   : > { %s192_s14 = scalar_lea.vmem [#allocation3], %s784_s24  ;;  %p1772_p0 = scmp.lt.s32.totalorder %s1271_s28, 8 }
  0x3e   : > { %1770 = sst [smem:[#allocation30_spill]] %s1769_s1  ;;  %s200_s3 = sshll.u32 %s192_s14, 4  ;;  %s201_s3 = int_to_ptr.vmem [resolvable:$true] %s200_s3 }
  0x3f   : > { %p841_p4 = pnand %p1772_p0, %p1438_p11  ;;  %s1773_s30 = sld [smem:[#allocation24_spill]] }
  0x40   : > { %s189_s1 = scalar_lea.sflag [#allocation4], %s188_s18  ;;  %s1774_s21 = smov 8  }
  0x41   : > { %s197_s9 = scalar_lea.hbm %s1771_s0, %s811_s29  ;;  %s1775_s27 = smov 128  }
  0x42   : > { %s198_s23 = sshll.u32 %s197_s9, 4  ;;  %s99_s8 = sadd.s32 1, %s1227_s17  ;;  %s199_s23 = int_to_ptr.hbm [resolvable:$true] %s198_s23 }
  0x43   : > { %843 = dma.hbm_to_vmem [thread:$0]  (!%p841_p4), %s199_s23, 512, %s201_s3, %s189_s1, %s1775_s27, %s1775_s27, %s1774_s21  }
  0x44   : > { %s1510_s24 = scalar_select %p97_p13, %s1227_s17, %s99_s8  }
  0x45   : > { %p106_p10 = scmp.ne.s32.totalorder %s1227_s17, %s1223_s16  ;;  %p112_p12 = scmp.ne.s32.totalorder %s1223_s16, %s1219_s15 }
  0x46   : > { %1776 = sst [smem:[#allocation31_spill]] %s1510_s24  ;;  %s233_s14 = sand.u32 1, %s1227_s17  }
  0x47   : > { %p1777_p9 = scmp.eq.s32.totalorder %s1271_s28, 0  ;;  %p1778_p6 = scmp.eq.s32.totalorder %s1422_s5, 0 }
  0x48   : > { %s789_s18 = sshll.u32 %s233_s14, 7  ;;  %s812_s25 = sshll.u32 %s1263_s26, 7 }
  0x49   : > { %p108_p1 = por %p106_p10, %p1777_p9  ;;  %p1521_p11 = por %p112_p12, %p1778_p6 }
  0x4a   : > { %s235_s3 = scalar_lea.vmem [#allocation8], %s789_s18  ;;  %s1780_s15 = smov 512  }
  0x4b   : > { %p847_p4 = pnand %p1772_p0, %p108_p1  ;;  %s243_s23 = sshll.u32 %s235_s3, 4  ;;  %s244_s23 = int_to_ptr.vmem [resolvable:$true] %s243_s23 }
  0x4c   : > { %s1781_s1 = int_to_ptr.hbm [resolvable:$true] %s1773_s30  ;;  %s1782_s9 = sld [smem:[#allocation35_spill]] }
  0x4d   : > { %849 = dma.hbm_to_vmem [thread:$0]  (!%p847_p4), %s1781_s1, 2048, %s244_s23, %s1404_s12, %s1780_s15, %s1775_s27, %s1774_s21  }
  0x4e   : > { %s257_s0 = scalar_lea.vmem [#allocation9], %s1388_s7  ;;  %s1783_s14 = sand.u32 1, %s1239_s20  }
  0x4f   : > { %s265_s24 = sshll.u32 %s257_s0, 4  ;;  %s254_s28 = scalar_lea.sflag [#allocation10], %s1783_s14  ;;  %s266_s24 = int_to_ptr.vmem [resolvable:$true] %s265_s24 }
  0x50   : > { %277 = sbr.rel (%p1417_p8) target bundleno = 493 (0x1ed), region = 36  ;;  %s1548_s12 = sand.u32 (!%p1417_p8), 1, %s1247_s22  }
  0x51   : > { %s795_s0 = sshll.u32 (!%p1417_p8), %s1548_s12, 5  ;;  %s280_s7 = scalar_lea.sflag (!%p1417_p8), [#allocation4], %s1548_s12 }
  0x52   : > { %s262_s8 = scalar_lea.hbm %s1782_s9, %s812_s25  ;;  %s1552_s30 = scalar_lea.vmem (!%p1417_p8), [#allocation3], %s795_s0 }
  0x53   : > { %s263_s17 = sshll.u32 %s262_s8, 4  ;;  %s264_s17 = int_to_ptr.hbm [resolvable:$true] %s263_s17 }
  0x54   : > { %852 = dma.hbm_to_vmem [thread:$0]  (!%p1397_p5), %s264_s17, 2048, %s266_s24, %s254_s28, %s1775_s27, %s1775_s27, %s1774_s21  }
  0x55   : > { %1198 = dma.done.wait (%p1455_p3), %s280_s7, 512  }
  0x56   : > { %1200 = vsyncadd (%p1455_p3), %s280_s7, 4294966784  ;;  %s289_s17 = sand.u32 1, %s1422_s5   ;;  %s291_s21 = sand.u32 1, %s1235_s19  }
  0x57   : > { %s796_s27 = sshll.u32 %s291_s21, 7  ;;  %s290_s28 = scalar_lea.sflag [#allocation7], %s289_s17 }
  0x58   : > { %s1560_s6 = scalar_lea.vmem [#allocation6], %s796_s27 }
  0x59   : > { %1202 = dma.done.wait (%p1466_p7), %s290_s28, 2048  }
  0x5a   : > { %1204 = vsyncadd (%p1466_p7), %s290_s28, 4294965248  ;;  %s301_s24 = sand.u32 1, %s1223_s16  }
  0x5b   : > { %s797_s3 = sshll.u32 %s301_s24, 7 }
  0x5c   : > { %s1567_s4 = scalar_lea.vmem [#allocation8], %s797_s3 }
  0x5d   : > { %1206 = dma.done.wait (%p1521_p11), %s290_s28, 2048  }
  0x5e   : > { %1208 = vsyncadd (%p1521_p11), %s290_s28, 4294965248  ;;  %s310_s5 = scalar_lea.sflag [#allocation10], %s291_s21  ;;  %s1573_s23 = scalar_lea.vmem [#allocation9], %s796_s27 }
  0x5f   : > { %1210 = dma.done.wait (%p1466_p7), %s310_s5, 2048  }
  0x60   : > { %1212 = vsyncadd (%p1466_p7), %s310_s5, 4294965248  ;;  %s1579_s25 = scalar_lea.vmem [#allocation11], %s795_s0  ;;  %s1785_s15 = sld [smem:[#allocation20_spill]] }
  0x66   : > { %p800_p5 = scmp.ne.s32.totalorder %s1785_s15, 0 }
  0x68   : > { %361 = sbr.rel (%p800_p5) target bundleno = 114 (0x72), region = 56 }
  0x6d   : > { %v1276_v0 = vmov 0.0  }
  0x6e   : > { %362 = vst [vmem:[#allocation2 + $0x10] sm:$0xff] %v1276_v0 }
  0x6f   : > { %363 = vst [vmem:[#allocation2] sm:$0xff] %v1276_v0 }
  0x70   : > { %364 = vst [vmem:[#allocation2 + $0x18] sm:$0xff] %v1276_v0 }
  0x71   : > { %365 = vst [vmem:[#allocation2 + $0x8] sm:$0xff] %v1276_v0 }
  0x72 PF: > { %v385_v1 = vld [vmem:[%s1560_s6 + $0x78] sm:$0xff]  ;;  %v384_v2 = vld [vmem:[%s1560_s6 + $0x70] sm:$0xff]  ;;  %v383_v3 = vld [vmem:[%s1560_s6 + $0x68] sm:$0xff]  ;;  %s1786_s2 = sld [smem:[#allocation20_spill]] }
  0x73   : > { %386 = vmatpush.msra.mxu0 %v385_v1  ;;  %814 = vmatpush.msra.mxu3 %v385_v1  ;;  %v382_v4 = vld [vmem:[%s1560_s6 + $0x60] sm:$0xff]  ;;  %v430_v5 = vld [vmem:[%s1567_s4 + $0x78] sm:$0xff]  ;;  %v429_v6 = vld [vmem:[%s1567_s4 + $0x70] sm:$0xff] }
  0x74   : > { %v381_v7 = vld [vmem:[%s1560_s6 + $0x58] sm:$0xff]  ;;  %431 = vmatpush.msra.mxu1 %v430_v5  ;;  %v428_v8 = vld [vmem:[%s1567_s4 + $0x68] sm:$0xff]  ;;  %v380_v9 = vld [vmem:[%s1560_s6 + $0x50] sm:$0xff] }
  0x75   : > { %387 = vmatpush.msra.mxu0 %v384_v2  ;;  %815 = vmatpush.msra.mxu3 %v384_v2  ;;  %v427_v10 = vld [vmem:[%s1567_s4 + $0x60] sm:$0xff]  ;;  %v379_v11 = vld [vmem:[%s1560_s6 + $0x48] sm:$0xff]  ;;  %v426_v12 = vld [vmem:[%s1567_s4 + $0x58] sm:$0xff] }
  0x76   : > { %432 = vmatpush.msra.mxu1 %v429_v6  ;;  %v378_v13 = vld [vmem:[%s1560_s6 + $0x40] sm:$0xff]  ;;  %v425_v14 = vld [vmem:[%s1567_s4 + $0x50] sm:$0xff]  ;;  %v377_v15 = vld [vmem:[%s1560_s6 + $0x38] sm:$0xff] }
  0x77   : > { %388 = vmatpush.msra.mxu0 %v383_v3  ;;  %816 = vmatpush.msra.mxu3 %v383_v3  ;;  %v424_v16 = vld [vmem:[%s1567_s4 + $0x48] sm:$0xff]  ;;  %v376_v17 = vld [vmem:[%s1560_s6 + $0x30] sm:$0xff]  ;;  %v423_v18 = vld [vmem:[%s1567_s4 + $0x40] sm:$0xff] }
  0x78   : > { %433 = vmatpush.msra.mxu1 %v428_v8  ;;  %v375_v19 = vld [vmem:[%s1560_s6 + $0x28] sm:$0xff]  ;;  %v422_v20 = vld [vmem:[%s1567_s4 + $0x38] sm:$0xff]  ;;  %v374_v21 = vld [vmem:[%s1560_s6 + $0x20] sm:$0xff]  ;;  %p805_p8 = scmp.ne.s32.totalorder %s1786_s2, 1 }
  0x79   : > { %389 = vmatpush.msra.mxu0 %v382_v4  ;;  %817 = vmatpush.msra.mxu3 %v382_v4  ;;  %v421_v22 = vld [vmem:[%s1567_s4 + $0x30] sm:$0xff]  ;;  %v373_v23 = vld [vmem:[%s1560_s6 + $0x18] sm:$0xff]  ;;  %v420_v24 = vld [vmem:[%s1567_s4 + $0x28] sm:$0xff] }
  0x7a   : > { %434 = vmatpush.msra.mxu1 %v427_v10  ;;  %v372_v25 = vld [vmem:[%s1560_s6 + $0x10] sm:$0xff]  ;;  %v419_v26 = vld [vmem:[%s1567_s4 + $0x20] sm:$0xff]  ;;  %v371_v27 = vld [vmem:[%s1560_s6 + $0x8] sm:$0xff] }
  0x7b   : > { %390 = vmatpush.msra.mxu0 %v381_v7  ;;  %818 = vmatpush.msra.mxu3 %v381_v7  ;;  %v418_v28 = vld [vmem:[%s1567_s4 + $0x18] sm:$0xff]  ;;  %v370_v29 = vld [vmem:[%s1560_s6] sm:$0xff]  ;;  %v367_v31 = vld [vmem:[%s1552_s30 + $0x8] sm:$0xff] }
  0x7c   : > { %435 = vmatpush.msra.mxu1 %v426_v12  ;;  %v366_v30 = vld [vmem:[%s1552_s30] sm:$0xff]  ;;  %v417_v32 = vld [vmem:[%s1567_s4 + $0x10] sm:$0xff]  ;;  %v416_v33 = vld [vmem:[%s1567_s4 + $0x8] sm:$0xff] }
  0x7d   : > { %391 = vmatpush.msra.mxu0 %v380_v9  ;;  %819 = vmatpush.msra.mxu3 %v380_v9  ;;  %v415_v34 = vld [vmem:[%s1567_s4] sm:$0xff]  ;;  %v368_v35 = vld [vmem:[%s1552_s30 + $0x10] sm:$0xff]  ;;  %v369_v36 = vld [vmem:[%s1552_s30 + $0x18] sm:$0xff] }
  0x7e   : > { %436 = vmatpush.msra.mxu1 %v425_v14  ;;  %v563_v37 = vld [vmem:[%s1573_s23 + $0x78] sm:$0xff]  ;;  %v562_v38 = vld [vmem:[%s1573_s23 + $0x70] sm:$0xff]  ;;  %v561_v39 = vld [vmem:[%s1573_s23 + $0x68] sm:$0xff] }
  0x7f   : > { %392 = vmatpush.msra.mxu0 %v379_v11  ;;  %820 = vmatpush.msra.mxu3 %v379_v11  ;;  %v560_v40 = vld [vmem:[%s1573_s23 + $0x60] sm:$0xff]  ;;  %v559_v41 = vld [vmem:[%s1573_s23 + $0x58] sm:$0xff]  ;;  %v558_v42 = vld [vmem:[%s1573_s23 + $0x50] sm:$0xff] }
  0x80   : > { %437 = vmatpush.msra.mxu1 %v424_v16  ;;  %564 = vmatpush.msra.mxu2 %v563_v37  ;;  %v557_v43 = vld [vmem:[%s1573_s23 + $0x48] sm:$0xff]  ;;  %v556_v44 = vld [vmem:[%s1573_s23 + $0x40] sm:$0xff]  ;;  %v555_v45 = vld [vmem:[%s1573_s23 + $0x38] sm:$0xff] }
  0x81   : > { %393 = vmatpush.msra.mxu0 %v378_v13  ;;  %821 = vmatpush.msra.mxu3 %v378_v13  ;;  %v554_v46 = vld [vmem:[%s1573_s23 + $0x30] sm:$0xff]  ;;  %v553_v47 = vld [vmem:[%s1573_s23 + $0x28] sm:$0xff]  ;;  %v552_v48 = vld [vmem:[%s1573_s23 + $0x20] sm:$0xff] }
  0x82   : > { %438 = vmatpush.msra.mxu1 %v423_v18  ;;  %565 = vmatpush.msra.mxu2 %v562_v38  ;;  %v551_v49 = vld [vmem:[%s1573_s23 + $0x18] sm:$0xff]  ;;  %v550_v50 = vld [vmem:[%s1573_s23 + $0x10] sm:$0xff]  ;;  %v549_v51 = vld [vmem:[%s1573_s23 + $0x8] sm:$0xff] }
  0x83   : > { %394 = vmatpush.msra.mxu0 %v377_v15  ;;  %822 = vmatpush.msra.mxu3 %v377_v15  ;;  %v548_v52 = vld [vmem:[%s1573_s23] sm:$0xff] }
  0x84   : > { %439 = vmatpush.msra.mxu1 %v422_v20  ;;  %566 = vmatpush.msra.mxu2 %v561_v39 }
  0x85   : > { %395 = vmatpush.msra.mxu0 %v376_v17  ;;  %823 = vmatpush.msra.mxu3 %v376_v17 }
  0x86   : > { %440 = vmatpush.msra.mxu1 %v421_v22  ;;  %567 = vmatpush.msra.mxu2 %v560_v40 }
  0x87   : > { %396 = vmatpush.msra.mxu0 %v375_v19  ;;  %824 = vmatpush.msra.mxu3 %v375_v19 }
  0x88   : > { %441 = vmatpush.msra.mxu1 %v420_v24  ;;  %568 = vmatpush.msra.mxu2 %v559_v41 }
  0x89   : > { %397 = vmatpush.msra.mxu0 %v374_v21  ;;  %825 = vmatpush.msra.mxu3 %v374_v21 }
  0x8a   : > { %442 = vmatpush.msra.mxu1 %v419_v26  ;;  %569 = vmatpush.msra.mxu2 %v558_v42 }
  0x8b   : > { %398 = vmatpush.msra.mxu0 %v373_v23  ;;  %826 = vmatpush.msra.mxu3 %v373_v23 }
  0x8c   : > { %443 = vmatpush.msra.mxu1 %v418_v28  ;;  %570 = vmatpush.msra.mxu2 %v557_v43 }
  0x8d   : > { %399 = vmatpush.msra.mxu0 %v372_v25  ;;  %827 = vmatpush.msra.mxu3 %v372_v25 }
  0x8e   : > { %444 = vmatpush.msra.mxu1 %v417_v32  ;;  %571 = vmatpush.msra.mxu2 %v556_v44 }
  0x8f   : > { %400 = vmatpush.msra.mxu0 %v371_v27  ;;  %828 = vmatpush.msra.mxu3 %v371_v27 }
  0x90   : > { %445 = vmatpush.msra.mxu1 %v416_v33  ;;  %572 = vmatpush.msra.mxu2 %v555_v45 }
  0x91   : > { %401 = vmatpush.msra.mxu0 %v370_v29  ;;  %829 = vmatpush.msra.mxu3 %v370_v29 }
  0x92   : > { %402 = vmatmul.f32.vlgmr.msra.gmra.mxu0 %v366_v30  ;;  %405 = vmatmul.f32.vlgmr.msra.gmra.mxu3 %v367_v31 }
  0x93   : > { %446 = vmatpush.msra.mxu1 %v415_v34  ;;  %573 = vmatpush.msra.mxu2 %v554_v46 }
  0x94   : > { %447 = vmatmul.f32.vlgmr.msra.gmra.mxu1 %v366_v30 }
  0x95   : > { %574 = vmatpush.msra.mxu2 %v553_v47 }
  0x97   : > { %575 = vmatpush.msra.mxu2 %v552_v48 }
  0x99   : > { %576 = vmatpush.msra.mxu2 %v551_v49 }
  0x9a   : > { %408 = vmatmul.f32.gmra.mxu3 %v368_v35 }
  0x9b   : > { %577 = vmatpush.msra.mxu2 %v550_v50 }
  0x9c   : > { %450 = vmatmul.f32.gmra.mxu1 %v367_v31 }
  0x9d   : > { %578 = vmatpush.msra.mxu2 %v549_v51 }
  0x9f   : > { %579 = vmatpush.msra.mxu2 %v548_v52 }
  0xa2   : > { %411 = vmatmul.f32.gmra.mxu3 %v369_v36 }
  0xa4   : > { %453 = vmatmul.f32.gmra.mxu1 %v368_v35 }
  0xac   : > { %456 = vmatmul.f32.gmra.mxu1 %v369_v36 }
 0x10f   : > { %v403_v53 = vpop.f32.mrf.mxu0 }
 0x110   : > { %v801_v54 = vmul.f32 -1.442695, %v403_v53 }
 0x111   : > { %v448_v4 = vpop.f32.mrf.mxu1 }
 0x112   : > { %977 = vpow2.f32 %v801_v54 }
 0x115   : > { %v406_v55 = vpop.f32.mrf.mxu3 }
 0x116   : > { %v802_v56 = vmul.f32 -1.442695, %v406_v55 }
 0x118   : > { %v978_v57 = vpop.eup %977  ;;  %979 = vpow2.f32 %v802_v56 }
 0x119   : > { %v472_v58 = vadd.f32 1.0, %v978_v57  ;;  %v451_v27 = vpop.f32.mrf.mxu1  ;;  %v544_v57 = vld [vmem:[#allocation2 + $0x10] sm:$0xff] }
 0x11b   : > { %981 = vrcp.f32 %v472_v58  ;;  %v487_v2 = vand.u32 2147483648, %v472_v58  ;;  %v485_v7 = vand.u32 2147483647, %v472_v58  ;;  %vm481_vm1 = vweird.f32 %v472_v58 }
 0x11d   : > { %v1634_v59 = vpop.f32.mrf.mxu3  ;;  %v488_v13 = vor.u32 1.1754944e-38, %v487_v2  ;;  %vm486_vm3 = vcmp.eq.f32.partialorder %v485_v7, 8.507059e+37  ;;  %v547_v2 = vld [vmem:[#allocation2 + $0x8] sm:$0xff] }
 0x11e   : > { %v980_v60 = vpop.eup %979  ;;  %v803_v61 = vmul.f32 -1.442695, %v1634_v59 }
 0x11f   : > { %v473_v62 = vadd.f32 1.0, %v980_v60  ;;  %v545_v60 = vld [vmem:[#allocation2] sm:$0xff] }
 0x120   : > { %983 = vpow2.f32 %v803_v61 }
 0x121   : > { %v982_v63 = vpop.eup %981  ;;  %985 = vrcp.f32 %v473_v62  ;;  %v502_v17 = vand.u32 2147483648, %v473_v62  ;;  %v500_v20 = vand.u32 2147483647, %v473_v62  ;;  %vm496_vm5 = vweird.f32 %v473_v62  ;;  %v454_v43 = vpop.f32.mrf.mxu1 }
 0x122   : > { %v477_v0 = vmul.f32 %v982_v63, %v472_v58  ;;  %vm482_vm0 = vweird.f32 %v982_v63 }
 0x123   : > { %vm483_vm2 = vmor %vm481_vm1, %vm482_vm0  ;;  %v503_v25 = vor.u32 1.1754944e-38, %v502_v17  ;;  %vm501_vm7 = vcmp.eq.f32.partialorder %v500_v20, 8.507059e+37 }
 0x124   : > { %v478_v1 = vsub.f32 1.0, %v477_v0 }
 0x125   : > { %v1637_v3 = vpop.f32.mrf.mxu3 }
 0x126   : > { %v984_v5 = vpop.eup %983  ;;  %v479_v6 = vmul.f32 %v982_v63, %v478_v1  ;;  %v804_v8 = vmul.f32 -1.442695, %v1637_v3 }
 0x127   : > { %v986_v9 = vpop.eup %985  ;;  %v474_v10 = vadd.f32 1.0, %v984_v5 }
 0x128   : > { %v480_v11 = vadd.f32 %v982_v63, %v479_v6  ;;  %v492_v12 = vmul.f32 %v986_v9, %v473_v62  ;;  %987 = vpow2.f32 %v804_v8  ;;  %vm497_vm4 = vweird.f32 %v986_v9 }
 0x129   : > { %989 = vrcp.f32 %v474_v10  ;;  %vm498_vm6 = vmor %vm496_vm5, %vm497_vm4  ;;  %v517_v33 = vand.u32 2147483648, %v474_v10  ;;  %v515_v35 = vand.u32 2147483647, %v474_v10  ;;  %vm511_vm9 = vweird.f32 %v474_v10 }
 0x12a   : > { %v484_v14 = vsel %vm483_vm2, %v982_v63, %v480_v11  ;;  %v493_v15 = vsub.f32 1.0, %v492_v12  ;;  %v546_v63 = vld [vmem:[#allocation2 + $0x18] sm:$0xff] }
 0x12b   : > { %v489_v16 = vsel %vm486_vm3, %v488_v13, %v484_v14  ;;  %v518_v39 = vor.u32 1.1754944e-38, %v517_v33  ;;  %vm516_vm11 = vcmp.eq.f32.partialorder %v515_v35, 8.507059e+37 }
 0x12c   : > { %v536_v18 = vmul.f32 %v489_v16, %v403_v53  ;;  %v494_v19 = vmul.f32 %v986_v9, %v493_v15 }
 0x12e   : > { %v988_v21 = vpop.eup %987  ;;  %v495_v22 = vadd.f32 %v986_v9, %v494_v19  ;;  %v540_v23 = vmul.f32 %v536_v18, %v448_v4 }
 0x12f   : > { %v990_v24 = vpop.eup %989  ;;  %v475_v26 = vadd.f32 1.0, %v988_v21 }
 0x130   : > { %v499_v28 = vsel %vm498_vm6, %v986_v9, %v495_v22  ;;  %v507_v29 = vmul.f32 %v990_v24, %v474_v10  ;;  %580 = vmatmul.f32.vlgmr.msra.gmra.mxu2 %v540_v23  ;;  %vm512_vm8 = vweird.f32 %v990_v24 }
 0x131   : > { %v504_v30 = vsel %vm501_vm7, %v503_v25, %v499_v28  ;;  %991 = vrcp.f32 %v475_v26  ;;  %vm513_vm10 = vmor %vm511_vm9, %vm512_vm8  ;;  %v532_v46 = vand.u32 2147483648, %v475_v26  ;;  %v530_v48 = vand.u32 2147483647, %v475_v26 }
 0x132   : > { %v537_v31 = vmul.f32 %v504_v30, %v406_v55  ;;  %v508_v32 = vsub.f32 1.0, %v507_v29  ;;  %vm526_vm13 = vweird.f32 %v475_v26  ;;  %v457_v55 = vpop.f32.mrf.mxu1 }
 0x133   : > { %v533_v51 = vor.u32 1.1754944e-38, %v532_v46  ;;  %vm531_vm15 = vcmp.eq.f32.partialorder %v530_v48, 8.507059e+37 }
 0x134   : > { %v509_v34 = vmul.f32 %v990_v24, %v508_v32  ;;  %v541_v37 = vmul.f32 %v537_v31, %v451_v27 }
 0x136   : > { %v510_v36 = vadd.f32 %v990_v24, %v509_v34 }
 0x137   : > { %v992_v38 = vpop.eup %991 }
 0x138   : > { %v514_v40 = vsel %vm513_vm10, %v990_v24, %v510_v36  ;;  %v522_v41 = vmul.f32 %v992_v38, %v475_v26  ;;  %583 = vmatmul.f32.gmra.mxu2 %v541_v37  ;;  %vm527_vm12 = vweird.f32 %v992_v38 }
 0x139   : > { %v519_v42 = vsel %vm516_vm11, %v518_v39, %v514_v40  ;;  %vm528_vm14 = vmor %vm526_vm13, %vm527_vm12 }
 0x13a   : > { %v538_v44 = vmul.f32 %v519_v42, %v1634_v59  ;;  %v523_v45 = vsub.f32 1.0, %v522_v41 }
 0x13c   : > { %v524_v47 = vmul.f32 %v992_v38, %v523_v45  ;;  %v542_v50 = vmul.f32 %v538_v44, %v454_v43 }
 0x13e   : > { %v525_v49 = vadd.f32 %v992_v38, %v524_v47 }
 0x140   : > { %v529_v52 = vsel %vm528_vm14, %v992_v38, %v525_v49  ;;  %586 = vmatmul.f32.gmra.mxu2 %v542_v50 }
 0x141   : > { %v534_v53 = vsel %vm531_vm15, %v533_v51, %v529_v52 }
 0x142   : > { %v539_v54 = vmul.f32 %v534_v53, %v1637_v3 }
 0x144   : > { %v543_v56 = vmul.f32 %v539_v54, %v457_v55 }
 0x148   : > { %589 = vmatmul.f32.gmra.mxu2 %v543_v56 }
 0x1b3   : > { %v581_v58 = vpop.f32.mrf.mxu2 }
 0x1b4   : > { %v593_v59 = vadd.f32 %v581_v58, %v544_v57 }
 0x1b6   : > { %597 = vst [vmem:[#allocation2 + $0x10] sm:$0xff] %v593_v59 }
 0x1bb   : > { %v584_v61 = vpop.f32.mrf.mxu2 }
 0x1bc   : > { %v594_v62 = vadd.f32 %v584_v61, %v545_v60 }
 0x1be   : > { %598 = vst [vmem:[#allocation2] sm:$0xff] %v594_v62 }
 0x1c3   : > { %v587_v0 = vpop.f32.mrf.mxu2 }
 0x1c4   : > { %v595_v1 = vadd.f32 %v587_v0, %v546_v63 }
 0x1c6   : > { %599 = vst [vmem:[#allocation2 + $0x18] sm:$0xff] %v595_v1 }
 0x1ca   : > { %604 = sbr.rel (%p805_p8) target bundleno = 471 (0x1d7), region = 60 }
 0x1cb   : > { %v590_v4 = vpop.f32.mrf.mxu2 }
 0x1cc   : > { %v596_v5 = vadd.f32 %v590_v4, %v547_v2 }
 0x1ce   : > { %600 = vst [vmem:[#allocation2 + $0x8] sm:$0xff] %v596_v5 }
 0x1cf   : > { %v605_v3 = vld [vmem:[#allocation2 + $0x10] sm:$0xff]  ;;  %v606_v6 = vld [vmem:[#allocation2] sm:$0xff]  ;;  %v607_v7 = vld [vmem:[#allocation2 + $0x18] sm:$0xff] }
 0x1d0   : > { %609 = vst [vmem:[%s1579_s25] sm:$0xff] %v605_v3 }
 0x1d1   : > { %610 = vst [vmem:[%s1579_s25 + $0x8] sm:$0xff] %v606_v6 }
 0x1d2   : > { %611 = vst [vmem:[%s1579_s25 + $0x10] sm:$0xff] %v607_v7 }
 0x1d5   : > { %v608_v8 = vld [vmem:[#allocation2 + $0x8] sm:$0xff] }
 0x1d6   : > { %612 = vst [vmem:[%s1579_s25 + $0x18] sm:$0xff] %v608_v8 }
 0x1d7 PF: > { %s1787_s10 = sld [smem:[#allocation21_spill]]  ;;  %s626_s14 = sshll.u32 %s1579_s25, 4  ;;  %s627_s14 = int_to_ptr.vmem [resolvable:$true] %s626_s14 }
 0x1d8   : > { %s1788_s9 = sld [smem:[#allocation36_spill]]  ;;  %s614_s0 = scalar_lea.sflag [#allocation5], %s1548_s12 }
 0x1dd   : > { %s813_s1 = sshll.u32 %s1787_s10, 5 }
 0x1de   : > { %s625_s8 = scalar_lea.hbm %s1788_s9, %s813_s1  ;;  %s1133_s27 = scalar_lea.hbm %s1788_s9, 128 }
 0x1df   : > { %s628_s18 = sshll.u32 %s625_s8, 4  ;;  %s629_s18 = int_to_ptr.hbm [resolvable:$true] %s628_s18 }
 0x1e0   : > { %s1127_s7 = sshra.s32 %s629_s18, 4  ;;  %s1128_s7 = int_to_ptr.hbm [resolvable:$true] %s1127_s7 }
 0x1e1   : > { %s1129_s30 = scalar_lea.hbm %s1128_s7, 32  ;;  %p1134_p13 = scmp.lt.s32.totalorder %s1128_s7, %s1788_s9 }
 0x1e2   : > { %p1130_p1 = scmp.ne.s32.totalorder %s1128_s7, %s1129_s30  ;;  %p1135_p6 = scmp.lt.s32.totalorder %s1133_s27, %s1129_s30 }
 0x1e4   : > { %p1131_p3 = pnand %p1130_p1, %p1485_p2  ;;  %p1136_p10 = por %p1135_p6, %p1134_p13 }
 0x1e6   : > { %p1132_p7 = pneg %p1131_p3 }
 0x1e8   : > { %p1137_p12 = pnand %p1136_p10, %p1132_p7 }
 0x1ea   : > { %1140 = shalt.err (!%p1137_p12)
}
 0x1eb   : > { %s1277_s12 = smov 128   ;;  %s1278_s24 = smov 8  }
 0x1ec   : > { %838 = dma.vmem_to_hbm [thread:$0]  (%p1485_p2), %s627_s14, 512, %s629_s18, %s614_s0, %s1277_s12, %s1277_s12, %s1278_s24  }
 0x1ed PF: > { %s1789_s3 = sld [smem:[#allocation23_spill]] }
 0x1ee   : > { %s1790_s4 = sld [smem:[#allocation18_spill]] }
 0x1ef   : > { %s1791_s5 = sld [smem:[#allocation30_spill]] }
 0x1f3   : > { %p858_p9 = scmp.ge.s32.totalorder %s1789_s3, 2 }
 0x1f4   : > { %s643_s23 = sand.u32 1, %s1790_s4  }
 0x1f5   : > { %p1792_p11 = scmp.ne.s32.totalorder %s1791_s5, 0  ;;  %s644_s25 = scalar_lea.sflag [#allocation5], %s643_s23 }
 0x1f7   : > { %p854_p0 = pnand %p858_p9, %p1792_p11 }
 0x1f9   : > { %p855_p4 = pneg %p854_p0 }
 0x1fb   : > { %1214 = dma.done.wait (%p855_p4), %s644_s25, 512  }
 0x1fc   : > { %1216 = vsyncadd (%p855_p4), %s644_s25, 4294966784  ;;  %s26_s28 = sadd.s32 1, %s1789_s3   ;;  %s1794_s11 = sld [smem:[#allocation17_spill]] }
 0x1fd   : > { %p1668_p5 = scmp.ge.s32.totalorder %s26_s28, 10   ;;  %s1795_s17 = sld [smem:[#allocation31_spill]] }
 0x1fe   : > { %s1796_s2 = sld [smem:[#allocation28_spill]]  ;;  %s1803_s15 = smov %s1223_s16 }
 0x1ff   : > { %s1797_s10 = sld [smem:[#allocation19_spill]]  ;;  %s1805_s18 = smov %s1235_s19 }
 0x200   : > { %s1798_s23 = sld [smem:[#allocation29_spill]]  ;;  %s1806_s19 = smov %s1239_s20 }
 0x201   : > { %s1799_s25 = sld [smem:[#allocation22_spill]]  ;;  %s1808_s21 = smov %s1247_s22 }
 0x202   : > { %s1800_s1 = sld [smem:[#allocation26_spill]]  ;;  %s1804_s16 = smov %s1794_s11 }
 0x203   : > { %s1801_s27 = sld [smem:[#allocation27_spill]]  ;;  %s1810_s24 = smov %s1263_s26 }
 0x204   : > { %s1807_s20 = smov %s1796_s2  ;;  %25 = sbr.rel (!%p1668_p5) target bundleno = 20 (0x14), region = 126 }
 0x205   : > { %s1809_s22 = smov %s1797_s10 }
 0x208   : > { %s1811_s26 = smov %s1800_s1 }
 0x209   :  { %650 = vsyncpa [#allocation4], 1 }
 0x20a   :  { %652 = vsyncpa [#allocation4 + $0x1], 1 }
 0x20b   :  { %653 = vsyncpa [#allocation7], 1 }
 0x20c   :  { %655 = vsyncpa [#allocation7 + $0x1], 1 }
 0x20d   :  { %656 = vsyncpa [#allocation10], 1 }
 0x20e   :  { %658 = vsyncpa [#allocation10 + $0x1], 1 }
 0x20f   :  { %659 = vsyncpa [#allocation5], 1 }
 0x210   :  { %661 = vsyncpa [#allocation5 + $0x1], 1 }

</bundles_post_ra>
